<compile_context>
chip_gen: v5e
topology: v5e:2x2
jax: 0.10.0
libtpu: 0.0.40
codegen_flags: <defaults>
</compile_context>

<pallas_src>
import functools

import jax
import jax.numpy as jnp
from jax.experimental import pallas as pl
from jax.experimental.pallas import tpu as pltpu


def lstm_recurrence_kernel(gx_ref, whh_ref, bias_ref, out_ref, h_ref, c_ref,
                           *, precision, unroll):
    """Runs Tb LSTM timesteps per grid invocation.

    gx_ref : (Tb, Bb, 4H) precomputed x@W_ih^T (no bias), gate order [i|f|o|g],
             streamed in matmul_dtype (bf16 by default).
    whh_ref: (H, 4H)      recurrent weight, pre-transposed, gate order [i|f|o|g].
    bias_ref: (1, 4H)     fused b_ih + b_hh in f32 (added here, on-chip).
    out_ref: (Bb, H)      last hidden state (written on the final time block only).
    h_ref, c_ref: (Bb, H) f32 VMEM scratch, persistent across grid steps.
    """
    t_blk = pl.program_id(1)

    # init recurrent state on the first time block (per batch block)
    @pl.when(t_blk == 0)
    def _():
        h_ref[...] = jnp.zeros_like(h_ref)
        c_ref[...] = jnp.zeros_like(c_ref)

    Tb = gx_ref.shape[0]
    Bb = h_ref.shape[0]
    H = h_ref.shape[1]

    # hoist resident (constant-index) loads / broadcasts out of the time loop
    whh = whh_ref[...]                                            # (H, 4H)
    bias = jnp.broadcast_to(bias_ref[...], (Bb, 4 * H))           # (Bb, 4H) f32

    def step(tt, carry):
        h, c = carry
        # only the recurrent matmul remains on the serial critical path
        gates = (gx_ref[tt].astype(jnp.float32) + bias
                 + jnp.dot(h.astype(whh.dtype), whh,
                           preferred_element_type=jnp.float32,
                           precision=precision))
        # gate order [i | f | o | g]: one slab of sigmoids, one slab of tanh.
        # sigmoid(x) == 0.5*tanh(0.5*x) + 0.5  -> 1 EUP push/elem instead of 2.
        sig = 0.5 * jnp.tanh(0.5 * gates[:, :3 * H]) + 0.5
        g_g = jnp.tanh(gates[:, 3 * H:])
        i_g = sig[:, 0 * H:1 * H]
        f_g = sig[:, 1 * H:2 * H]
        o_g = sig[:, 2 * H:3 * H]
        c = f_g * c + i_g * g_g
        h = o_g * jnp.tanh(c)
        return h, c

    h, c = jax.lax.fori_loop(0, Tb, step, (h_ref[...], c_ref[...]),
                             unroll=unroll)
    h_ref[...] = h
    c_ref[...] = c

    # final time block: emit last hidden state (latent projection done by XLA)
    @pl.when(t_blk == pl.num_programs(1) - 1)
    def _():
        out_ref[...] = h.astype(out_ref.dtype)


def _round_up(x, m):
    return (x + m - 1) // m * m


def lstm_encoder(x, params, *, time_block=None, batch_blocks=1,
                 matmul_dtype=jnp.bfloat16, vmem_budget_bytes=32 * 1024 * 1024,
                 core_parallel_batch=False):
    """x: (B, T, input_size) float32. Returns latent (B, latent_size)."""
    w_ih, w_hh, b_ih, b_hh, w_lat, b_lat = (
        params["w_ih"], params["w_hh"], params["b_ih"], params["b_hh"],
        params["w_lat"], params["b_lat"])

    B, T, _ = x.shape
    H = w_hh.shape[1]

    # f32 path uses true-f32 matmuls everywhere so it matches the reference tightly.
    prec = (jax.lax.Precision.HIGHEST if jnp.dtype(matmul_dtype) == jnp.float32
            else jax.lax.Precision.DEFAULT)

    # --- glue (outside the kernel) -------------------------------------------
    # Reorder PyTorch gate order (i, f, g, o) -> (i, f, o, g): sigmoids form one
    # contiguous slab and tanh(g) is the trailing slab inside the kernel.
    perm = jnp.concatenate([jnp.arange(0 * H, 1 * H), jnp.arange(1 * H, 2 * H),
                            jnp.arange(3 * H, 4 * H), jnp.arange(2 * H, 3 * H)])
    w_ih_r = w_ih[perm]                                 # (4H, I)
    w_hh_r = w_hh[perm]                                 # (4H, H)
    bias2d = (b_ih + b_hh)[perm].reshape(1, 4 * H).astype(jnp.float32)

    # Hoisted input projection: one big MXU GEMM producing time-major gate
    # pre-activations (f32 accumulate), then downcast for streaming.
    gx = jnp.einsum("bti,gi->tbg",
                    x.astype(matmul_dtype), w_ih_r.astype(matmul_dtype),
                    preferred_element_type=jnp.float32, precision=prec)
    gx = gx.astype(matmul_dtype)                        # (T, B, 4H) streamed dtype

    whh_t = jnp.transpose(w_hh_r, (1, 0)).astype(matmul_dtype)   # (H, 4H)

    # --- grid / blocking ------------------------------------------------------
    nb = batch_blocks
    assert B % nb == 0, "batch_blocks must divide B"
    Bb = B // nb
    if nb > 1:
        # (8,128) BlockSpec rule: with nb>1 the batch block is no longer the full dim.
        assert Bb % 8 == 0, "batch_blocks>1 requires per-block batch to be a multiple of 8"

    bytes_s = jnp.dtype(matmul_dtype).itemsize
    Bb_pad = _round_up(Bb, 8)
    G_pad = _round_up(4 * H, 128)
    H_pad = _round_up(H, 128)

    if time_block is None:
        # largest divisor of T whose double-buffered gx tile fits the streaming budget
        per_t = 2 * Bb_pad * G_pad * bytes_s
        tb = max(1, min(T, vmem_budget_bytes // max(per_t, 1)))
        while T % tb:
            tb -= 1
        Tb = tb
    else:
        Tb = min(time_block, T)
    assert T % Tb == 0, "time_block must divide T"
    nt = T // Tb

    # Generation-aware VMEM limit from actual (padded) buffers + headroom.
    gx_tile = Tb * Bb_pad * G_pad * bytes_s             # per pipeline buffer
    whh_b = _round_up(H, 8) * G_pad * bytes_s           # single-buffered
    bias_b = 8 * G_pad * 4                              # single-buffered
    state_b = 2 * Bb_pad * H_pad * 4                    # h + c scratch
    out_b = 2 * Bb_pad * H_pad * 4                      # double-buffered output
    needed = 2 * gx_tile + whh_b + bias_b + state_b + out_b
    vmem_limit = int(min(max(2 * needed + (4 << 20), 16 << 20), 100 << 20))

    if nb > 1 and core_parallel_batch:
        # v7x: shard independent batch blocks across the 2 TensorCores.
        dims = (pltpu.CORE_PARALLEL, pltpu.ARBITRARY)
    else:
        dims = ("parallel", "arbitrary")

    kernel = functools.partial(lstm_recurrence_kernel,
                               precision=prec, unroll=int(min(Tb, 8)))

    h_last = pl.pallas_call(
        kernel,
        out_shape=jax.ShapeDtypeStruct((B, H), jnp.float32),
        grid=(nb, nt),
        in_specs=[
            # streamed gate pre-activations (double-buffered by the pipeline)
            pl.BlockSpec((Tb, Bb, 4 * H), lambda b, t: (t, b, 0)),
            # constant-index operands: single pipeline buffer (no wasted VMEM copy)
            pl.BlockSpec((H, 4 * H), lambda b, t: (0, 0),
                         pipeline_mode=pl.Buffered(buffer_count=1)),
            pl.BlockSpec((1, 4 * H), lambda b, t: (0, 0),
                         pipeline_mode=pl.Buffered(buffer_count=1)),
        ],
        out_specs=pl.BlockSpec((Bb, H), lambda b, t: (b, 0)),
        scratch_shapes=[
            pltpu.VMEM((Bb, H), jnp.float32),   # h state
            pltpu.VMEM((Bb, H), jnp.float32),   # c state
        ],
        compiler_params=pltpu.CompilerParams(
            dimension_semantics=dims,
            vmem_limit_bytes=vmem_limit),
    )(gx, whh_t, bias2d)

    # Final latent projection outside the recurrent kernel (tiny GEMM, XLA).
    latent = jnp.dot(h_last, jnp.transpose(w_lat, (1, 0)),
                     precision=jax.lax.Precision.HIGHEST) + b_lat
    return latent.astype(x.dtype)


def lstm_encoder_ref(x, params):
    """Pure-JAX reference matching PyTorch nn.LSTM semantics (single layer)."""
    w_ih, w_hh, b_ih, b_hh, w_lat, b_lat = (
        params["w_ih"], params["w_hh"], params["b_ih"], params["b_hh"],
        params["w_lat"], params["b_lat"])
    B, T, _ = x.shape
    H = w_hh.shape[1]
    hp = jax.lax.Precision.HIGHEST
    h = jnp.zeros((B, H), jnp.float32)
    c = jnp.zeros((B, H), jnp.float32)
    for t in range(T):
        gates = (jnp.dot(x[:, t, :], w_ih.T, precision=hp)
                 + jnp.dot(h, w_hh.T, precision=hp) + b_ih + b_hh)
        i_g = jax.nn.sigmoid(gates[:, 0:H])
        f_g = jax.nn.sigmoid(gates[:, H:2 * H])
        g_g = jnp.tanh(gates[:, 2 * H:3 * H])
        o_g = jax.nn.sigmoid(gates[:, 3 * H:4 * H])
        c = f_g * c + i_g * g_g
        h = o_g * jnp.tanh(c)
    return jnp.dot(h, w_lat.T, precision=hp) + b_lat


if __name__ == "__main__":
    # small shapes consistent with the module's forward
    B, T, I, H, L = 2, 8, 16, 32, 8

    key = jax.random.PRNGKey(0)
    ks = jax.random.split(key, 7)
    scale = 1.0 / jnp.sqrt(H)  # mimic PyTorch uniform(-1/sqrt(H), 1/sqrt(H))
    params = {
        "w_ih": jax.random.uniform(ks[0], (4 * H, I), jnp.float32, -scale, scale),
        "w_hh": jax.random.uniform(ks[1], (4 * H, H), jnp.float32, -scale, scale),
        "b_ih": jax.random.uniform(ks[2], (4 * H,), jnp.float32, -scale, scale),
        "b_hh": jax.random.uniform(ks[3], (4 * H,), jnp.float32, -scale, scale),
        "w_lat": jax.random.uniform(ks[4], (L, H), jnp.float32, -scale, scale),
        "b_lat": jax.random.uniform(ks[5], (L,), jnp.float32, -scale, scale),
    }
    x = jax.random.normal(ks[6], (B, T, I), jnp.float32)

    ref = lstm_encoder_ref(x, params)

    # f32 path, time_block < T to exercise the h/c state carry across grid steps
    latent_f32 = lstm_encoder(x, params, time_block=4, matmul_dtype=jnp.float32)
    latent_f32 = jax.block_until_ready(latent_f32)
    assert latent_f32.shape == (B, L)
    assert jnp.allclose(latent_f32, ref, atol=1e-4, rtol=1e-4), "f32 mismatch vs reference"

    # default bf16-streaming path (auto time_block, bf16 gx + W_hh, f32 elementwise)
    latent_bf16 = lstm_encoder(x, params)
    latent_bf16 = jax.block_until_ready(latent_bf16)
    assert latent_bf16.shape == (B, L)
    assert jnp.allclose(latent_bf16, ref, atol=1e-1, rtol=1e-1), "bf16 mismatch vs reference"

    print("KERNEL_OK")
</pallas_src>

<mosaic_0001>
module attributes {stable_mosaic.version = 11 : i64} {
  func.func @lstm_recurrence_kernel(%arg0: i32, %arg1: i32, %arg2: memref<4x2x128xf32, #tpu.memory_space<vmem>>, %arg3: memref<32x128xf32, #tpu.memory_space<vmem>>, %arg4: memref<1x128xf32, #tpu.memory_space<vmem>>, %arg5: memref<2x32xf32, #tpu.memory_space<vmem>>, %arg6: memref<2x32xf32, #tpu.memory_space<vmem>>, %arg7: memref<2x32xf32, #tpu.memory_space<vmem>>) attributes {dimension_semantics = [#tpu.dimension_semantics<parallel>, #tpu.dimension_semantics<arbitrary>], iteration_bounds = array<i64: 1, 2>, scalar_prefetch = 0 : i64, scratch_operands = 2 : i64, tpu.core_type = #tpu.core_type<tc>, window_params = [{transform_indices = @transform_0, window_bounds = array<i64: 4, 2, 128>}, {pipeline_mode = #tpu.pipeline_mode<synchronous>, transform_indices = @transform_1, window_bounds = array<i64: 32, 128>}, {pipeline_mode = #tpu.pipeline_mode<synchronous>, transform_indices = @transform_2, window_bounds = array<i64: 1, 128>}, {transform_indices = @transform_3, window_bounds = array<i64: 2, 32>}]} {
    %c0_i32 = arith.constant 0 : i32
    %0 = arith.cmpi eq, %arg1, %c0_i32 : i32
    %1 = arith.extui %0 : i1 to i32
    %c0_i32_0 = arith.constant 0 : i32
    %2 = arith.cmpi ne, %1, %c0_i32_0 : i32
    scf.if %2 {
      %cst_38 = arith.constant 0.000000e+00 : f32
      %110 = vector.broadcast %cst_38 : f32 to vector<2x32xf32>
      %c0_39 = arith.constant 0 : index
      %c0_40 = arith.constant 0 : index
      %111 = vector.load %arg6[%c0_39, %c0_40] : memref<2x32xf32, #tpu.memory_space<vmem>>, vector<2x32xf32>
      tpu.vector_store %arg6[%c0_39, %c0_40], %110 {strides = array<i32>} : memref<2x32xf32, #tpu.memory_space<vmem>>, vector<2x32xf32>,
      %cst_41 = arith.constant 0.000000e+00 : f32
      %112 = vector.broadcast %cst_41 : f32 to vector<2x32xf32>
      %c0_42 = arith.constant 0 : index
      %c0_43 = arith.constant 0 : index
      %113 = vector.load %arg7[%c0_42, %c0_43] : memref<2x32xf32, #tpu.memory_space<vmem>>, vector<2x32xf32>
      tpu.vector_store %arg7[%c0_42, %c0_43], %112 {strides = array<i32>} : memref<2x32xf32, #tpu.memory_space<vmem>>, vector<2x32xf32>,
    } else {
    }
    %c0 = arith.constant 0 : index
    %c0_1 = arith.constant 0 : index
    %3 = vector.load %arg3[%c0, %c0_1] : memref<32x128xf32, #tpu.memory_space<vmem>>, vector<32x128xf32>
    %c0_2 = arith.constant 0 : index
    %c0_3 = arith.constant 0 : index
    %4 = vector.load %arg4[%c0_2, %c0_3] : memref<1x128xf32, #tpu.memory_space<vmem>>, vector<1x128xf32>
    %5 = vector.shape_cast %4 : vector<1x128xf32> to vector<1x128xf32>
    %6 = vector.broadcast %5 : vector<1x128xf32> to vector<2x128xf32>
    %c0_4 = arith.constant 0 : index
    %c0_5 = arith.constant 0 : index
    %7 = vector.load %arg6[%c0_4, %c0_5] : memref<2x32xf32, #tpu.memory_space<vmem>>, vector<2x32xf32>
    %c0_6 = arith.constant 0 : index
    %c0_7 = arith.constant 0 : index
    %8 = vector.load %arg7[%c0_6, %c0_7] : memref<2x32xf32, #tpu.memory_space<vmem>>, vector<2x32xf32>
    %c0_i32_8 = arith.constant 0 : i32
    %9 = arith.index_cast %c0_i32_8 : i32 to index
    %c0_9 = arith.constant 0 : index
    %c0_10 = arith.constant 0 : index
    %10 = vector.load %arg2[%9, %c0_9, %c0_10] : memref<4x2x128xf32, #tpu.memory_space<vmem>>, vector<1x2x128xf32>
    %11 = vector.shape_cast %10 : vector<1x2x128xf32> to vector<2x128xf32>
    %12 = arith.addf %11, %6 : vector<2x128xf32>
    %cst = arith.constant dense<0.000000e+00> : vector<2x128xf32>
    %13 = tpu.matmul %7, %3, %cst {dimension_numbers = #tpu.dot_dimension_numbers<[1], [0], [0], [1], [0, 0, 1, 1], [], []>, precision = #tpu.contract_precision<fp32>} : vector<2x32xf32>, vector<32x128xf32>, vector<2x128xf32> -> vector<2x128xf32>
    %14 = arith.addf %12, %13 : vector<2x128xf32>
    %15 = vector.extract_strided_slice %14 {offsets = [0, 0], sizes = [2, 96], strides = [1, 1]} : vector<2x128xf32> to vector<2x96xf32>
    %cst_11 = arith.constant 5.000000e-01 : f32
    %16 = vector.broadcast %cst_11 : f32 to vector<2x96xf32>
    %17 = arith.mulf %16, %15 : vector<2x96xf32>
    %18 = math.tanh %17 : vector<2x96xf32>
    %cst_12 = arith.constant 5.000000e-01 : f32
    %19 = vector.broadcast %cst_12 : f32 to vector<2x96xf32>
    %20 = arith.mulf %19, %18 : vector<2x96xf32>
    %cst_13 = arith.constant 5.000000e-01 : f32
    %21 = vector.broadcast %cst_13 : f32 to vector<2x96xf32>
    %22 = arith.addf %20, %21 : vector<2x96xf32>
    %23 = vector.extract_strided_slice %14 {offsets = [0, 96], sizes = [2, 32], strides = [1, 1]} : vector<2x128xf32> to vector<2x32xf32>
    %24 = math.tanh %23 : vector<2x32xf32>
    %25 = vector.extract_strided_slice %22 {offsets = [0, 0], sizes = [2, 32], strides = [1, 1]} : vector<2x96xf32> to vector<2x32xf32>
    %26 = vector.extract_strided_slice %22 {offsets = [0, 32], sizes = [2, 32], strides = [1, 1]} : vector<2x96xf32> to vector<2x32xf32>
    %27 = vector.extract_strided_slice %22 {offsets = [0, 64], sizes = [2, 32], strides = [1, 1]} : vector<2x96xf32> to vector<2x32xf32>
    %28 = arith.mulf %26, %8 : vector<2x32xf32>
    %29 = arith.mulf %25, %24 : vector<2x32xf32>
    %30 = arith.addf %28, %29 : vector<2x32xf32>
    %31 = math.tanh %30 : vector<2x32xf32>
    %32 = arith.mulf %27, %31 : vector<2x32xf32>
    %c1_i32 = arith.constant 1 : i32
    %33 = arith.index_cast %c1_i32 : i32 to index
    %c0_14 = arith.constant 0 : index
    %c0_15 = arith.constant 0 : index
    %34 = vector.load %arg2[%33, %c0_14, %c0_15] : memref<4x2x128xf32, #tpu.memory_space<vmem>>, vector<1x2x128xf32>
    %35 = vector.shape_cast %34 : vector<1x2x128xf32> to vector<2x128xf32>
    %36 = arith.addf %35, %6 : vector<2x128xf32>
    %cst_16 = arith.constant dense<0.000000e+00> : vector<2x128xf32>
    %37 = tpu.matmul %32, %3, %cst_16 {dimension_numbers = #tpu.dot_dimension_numbers<[1], [0], [0], [1], [0, 0, 1, 1], [], []>, precision = #tpu.contract_precision<fp32>} : vector<2x32xf32>, vector<32x128xf32>, vector<2x128xf32> -> vector<2x128xf32>
    %38 = arith.addf %36, %37 : vector<2x128xf32>
    %39 = vector.extract_strided_slice %38 {offsets = [0, 0], sizes = [2, 96], strides = [1, 1]} : vector<2x128xf32> to vector<2x96xf32>
    %cst_17 = arith.constant 5.000000e-01 : f32
    %40 = vector.broadcast %cst_17 : f32 to vector<2x96xf32>
    %41 = arith.mulf %40, %39 : vector<2x96xf32>
    %42 = math.tanh %41 : vector<2x96xf32>
    %cst_18 = arith.constant 5.000000e-01 : f32
    %43 = vector.broadcast %cst_18 : f32 to vector<2x96xf32>
    %44 = arith.mulf %43, %42 : vector<2x96xf32>
    %cst_19 = arith.constant 5.000000e-01 : f32
    %45 = vector.broadcast %cst_19 : f32 to vector<2x96xf32>
    %46 = arith.addf %44, %45 : vector<2x96xf32>
    %47 = vector.extract_strided_slice %38 {offsets = [0, 96], sizes = [2, 32], strides = [1, 1]} : vector<2x128xf32> to vector<2x32xf32>
    %48 = math.tanh %47 : vector<2x32xf32>
    %49 = vector.extract_strided_slice %46 {offsets = [0, 0], sizes = [2, 32], strides = [1, 1]} : vector<2x96xf32> to vector<2x32xf32>
    %50 = vector.extract_strided_slice %46 {offsets = [0, 32], sizes = [2, 32], strides = [1, 1]} : vector<2x96xf32> to vector<2x32xf32>
    %51 = vector.extract_strided_slice %46 {offsets = [0, 64], sizes = [2, 32], strides = [1, 1]} : vector<2x96xf32> to vector<2x32xf32>
    %52 = arith.mulf %50, %30 : vector<2x32xf32>
    %53 = arith.mulf %49, %48 : vector<2x32xf32>
    %54 = arith.addf %52, %53 : vector<2x32xf32>
    %55 = math.tanh %54 : vector<2x32xf32>
    %56 = arith.mulf %51, %55 : vector<2x32xf32>
    %c2_i32 = arith.constant 2 : i32
    %57 = arith.index_cast %c2_i32 : i32 to index
    %c0_20 = arith.constant 0 : index
    %c0_21 = arith.constant 0 : index
    %58 = vector.load %arg2[%57, %c0_20, %c0_21] : memref<4x2x128xf32, #tpu.memory_space<vmem>>, vector<1x2x128xf32>
    %59 = vector.shape_cast %58 : vector<1x2x128xf32> to vector<2x128xf32>
    %60 = arith.addf %59, %6 : vector<2x128xf32>
    %cst_22 = arith.constant dense<0.000000e+00> : vector<2x128xf32>
    %61 = tpu.matmul %56, %3, %cst_22 {dimension_numbers = #tpu.dot_dimension_numbers<[1], [0], [0], [1], [0, 0, 1, 1], [], []>, precision = #tpu.contract_precision<fp32>} : vector<2x32xf32>, vector<32x128xf32>, vector<2x128xf32> -> vector<2x128xf32>
    %62 = arith.addf %60, %61 : vector<2x128xf32>
    %63 = vector.extract_strided_slice %62 {offsets = [0, 0], sizes = [2, 96], strides = [1, 1]} : vector<2x128xf32> to vector<2x96xf32>
    %cst_23 = arith.constant 5.000000e-01 : f32
    %64 = vector.broadcast %cst_23 : f32 to vector<2x96xf32>
    %65 = arith.mulf %64, %63 : vector<2x96xf32>
    %66 = math.tanh %65 : vector<2x96xf32>
    %cst_24 = arith.constant 5.000000e-01 : f32
    %67 = vector.broadcast %cst_24 : f32 to vector<2x96xf32>
    %68 = arith.mulf %67, %66 : vector<2x96xf32>
    %cst_25 = arith.constant 5.000000e-01 : f32
    %69 = vector.broadcast %cst_25 : f32 to vector<2x96xf32>
    %70 = arith.addf %68, %69 : vector<2x96xf32>
    %71 = vector.extract_strided_slice %62 {offsets = [0, 96], sizes = [2, 32], strides = [1, 1]} : vector<2x128xf32> to vector<2x32xf32>
    %72 = math.tanh %71 : vector<2x32xf32>
    %73 = vector.extract_strided_slice %70 {offsets = [0, 0], sizes = [2, 32], strides = [1, 1]} : vector<2x96xf32> to vector<2x32xf32>
    %74 = vector.extract_strided_slice %70 {offsets = [0, 32], sizes = [2, 32], strides = [1, 1]} : vector<2x96xf32> to vector<2x32xf32>
    %75 = vector.extract_strided_slice %70 {offsets = [0, 64], sizes = [2, 32], strides = [1, 1]} : vector<2x96xf32> to vector<2x32xf32>
    %76 = arith.mulf %74, %54 : vector<2x32xf32>
    %77 = arith.mulf %73, %72 : vector<2x32xf32>
    %78 = arith.addf %76, %77 : vector<2x32xf32>
    %79 = math.tanh %78 : vector<2x32xf32>
    %80 = arith.mulf %75, %79 : vector<2x32xf32>
    %c3_i32 = arith.constant 3 : i32
    %81 = arith.index_cast %c3_i32 : i32 to index
    %c0_26 = arith.constant 0 : index
    %c0_27 = arith.constant 0 : index
    %82 = vector.load %arg2[%81, %c0_26, %c0_27] : memref<4x2x128xf32, #tpu.memory_space<vmem>>, vector<1x2x128xf32>
    %83 = vector.shape_cast %82 : vector<1x2x128xf32> to vector<2x128xf32>
    %84 = arith.addf %83, %6 : vector<2x128xf32>
    %cst_28 = arith.constant dense<0.000000e+00> : vector<2x128xf32>
    %85 = tpu.matmul %80, %3, %cst_28 {dimension_numbers = #tpu.dot_dimension_numbers<[1], [0], [0], [1], [0, 0, 1, 1], [], []>, precision = #tpu.contract_precision<fp32>} : vector<2x32xf32>, vector<32x128xf32>, vector<2x128xf32> -> vector<2x128xf32>
    %86 = arith.addf %84, %85 : vector<2x128xf32>
    %87 = vector.extract_strided_slice %86 {offsets = [0, 0], sizes = [2, 96], strides = [1, 1]} : vector<2x128xf32> to vector<2x96xf32>
    %cst_29 = arith.constant 5.000000e-01 : f32
    %88 = vector.broadcast %cst_29 : f32 to vector<2x96xf32>
    %89 = arith.mulf %88, %87 : vector<2x96xf32>
    %90 = math.tanh %89 : vector<2x96xf32>
    %cst_30 = arith.constant 5.000000e-01 : f32
    %91 = vector.broadcast %cst_30 : f32 to vector<2x96xf32>
    %92 = arith.mulf %91, %90 : vector<2x96xf32>
    %cst_31 = arith.constant 5.000000e-01 : f32
    %93 = vector.broadcast %cst_31 : f32 to vector<2x96xf32>
    %94 = arith.addf %92, %93 : vector<2x96xf32>
    %95 = vector.extract_strided_slice %86 {offsets = [0, 96], sizes = [2, 32], strides = [1, 1]} : vector<2x128xf32> to vector<2x32xf32>
    %96 = math.tanh %95 : vector<2x32xf32>
    %97 = vector.extract_strided_slice %94 {offsets = [0, 0], sizes = [2, 32], strides = [1, 1]} : vector<2x96xf32> to vector<2x32xf32>
    %98 = vector.extract_strided_slice %94 {offsets = [0, 32], sizes = [2, 32], strides = [1, 1]} : vector<2x96xf32> to vector<2x32xf32>
    %99 = vector.extract_strided_slice %94 {offsets = [0, 64], sizes = [2, 32], strides = [1, 1]} : vector<2x96xf32> to vector<2x32xf32>
    %100 = arith.mulf %98, %78 : vector<2x32xf32>
    %101 = arith.mulf %97, %96 : vector<2x32xf32>
    %102 = arith.addf %100, %101 : vector<2x32xf32>
    %103 = math.tanh %102 : vector<2x32xf32>
    %104 = arith.mulf %99, %103 : vector<2x32xf32>
    %c4_i32 = arith.constant 4 : i32
    %c0_32 = arith.constant 0 : index
    %c0_33 = arith.constant 0 : index
    %105 = vector.load %arg6[%c0_32, %c0_33] : memref<2x32xf32, #tpu.memory_space<vmem>>, vector<2x32xf32>
    tpu.vector_store %arg6[%c0_32, %c0_33], %104 {strides = array<i32>} : memref<2x32xf32, #tpu.memory_space<vmem>>, vector<2x32xf32>,
    %c0_34 = arith.constant 0 : index
    %c0_35 = arith.constant 0 : index
    %106 = vector.load %arg7[%c0_34, %c0_35] : memref<2x32xf32, #tpu.memory_space<vmem>>, vector<2x32xf32>
    tpu.vector_store %arg7[%c0_34, %c0_35], %102 {strides = array<i32>} : memref<2x32xf32, #tpu.memory_space<vmem>>, vector<2x32xf32>,
    %c1_i32_36 = arith.constant 1 : i32
    %107 = arith.cmpi eq, %arg1, %c1_i32_36 : i32
    %108 = arith.extui %107 : i1 to i32
    %c0_i32_37 = arith.constant 0 : i32
    %109 = arith.cmpi ne, %108, %c0_i32_37 : i32
    scf.if %109 {
      %c0_38 = arith.constant 0 : index
      %c0_39 = arith.constant 0 : index
      %110 = vector.load %arg5[%c0_38, %c0_39] : memref<2x32xf32, #tpu.memory_space<vmem>>, vector<2x32xf32>
      tpu.vector_store %arg5[%c0_38, %c0_39], %104 {strides = array<i32>} : memref<2x32xf32, #tpu.memory_space<vmem>>, vector<2x32xf32>,
    } else {
    }
    return
  }
  func.func @transform_0(%arg0: i32, %arg1: i32) -> (i32, i32, i32) {
    %c0_i32 = arith.constant 0 : i32
    %c0_i32_0 = arith.constant 0 : i32
    return %arg1, %arg0, %c0_i32 : i32, i32, i32
  }
  func.func @transform_1(%arg0: i32, %arg1: i32) -> (i32, i32) {
    %c0_i32 = arith.constant 0 : i32
    %c0_i32_0 = arith.constant 0 : i32
    %c0_i32_1 = arith.constant 0 : i32
    return %c0_i32, %c0_i32_0 : i32, i32
  }
  func.func @transform_2(%arg0: i32, %arg1: i32) -> (i32, i32) {
    %c0_i32 = arith.constant 0 : i32
    %c0_i32_0 = arith.constant 0 : i32
    %c0_i32_1 = arith.constant 0 : i32
    return %c0_i32, %c0_i32_0 : i32, i32
  }
  func.func @transform_3(%arg0: i32, %arg1: i32) -> (i32, i32) {
    %c0_i32 = arith.constant 0 : i32
    %c0_i32_0 = arith.constant 0 : i32
    return %arg0, %c0_i32 : i32, i32
  }
}

</mosaic_0001>

<bundles_post_ra>
// kernel: tpu_custom_call.1
= control target key start
LH: loop header
LB: loop body
LE: loop exit
PB: predicated region body
PF: predicated region fallthrough
CT: control target
= control target key end

     0   :  { %8 = vsyncpa [#allocation5], 0  ;;  %s1805_s0 = inlined_call_operand.hbm [shape: f32[8,2,128], index: 0, kind: input, shape index: {}]   ;;  %s1806_s1 = inlined_call_operand.hbm [shape: f32[32,128], index: 1, kind: input, shape index: {}]   ;;  %s1807_s2 = inlined_call_operand.vmem [shape: f32[1,128], index: 2, kind: input, shape index: {}]   ;;  %s1808_s3 = inlined_call_operand.hbm [shape: f32[2,32], index: 3, kind: output, shape index: {}]  }
   0x1   :  { %10 = vsyncpa [#allocation5 + $0x1], 0 }
   0x2   :  { %11 = vsyncpa [#allocation8], 0 }
   0x3   :  { %12 = vsyncpa [#allocation6], 0  ;;  %s1504_s12 = smov 0   ;;  %s1506_s13 = smov 0  }
   0x4   :  { %s1508_s14 = smov 0   ;;  %s1510_s15 = smov 0  }
   0x5   :  { %s1512_s16 = smov 0   ;;  %s1514_s17 = smov 0  }
   0x6 LB: > { %s1200_s18 = sadd.s32 4294967295, %s1472_s17   ;;  %p52_p0 = scmp.ne.s32.totalorder %s1456_s13, %s1452_s12  ;;  %s1472_s17 = sphi %s1514_s17, %s18_s17   ;;  %s1468_s16 = sphi %s1512_s16, %s1817_s16   ;;  %s1464_s15 = sphi %s1510_s15, %s1816_s15   ;;  %s1460_s14 = sphi %s1508_s14, %s1815_s14   ;;  %s1456_s13 = sphi %s1506_s13, %s1814_s13   ;;  %s1452_s12 = sphi %s1504_s12, %s1813_s12  }
   0x7   : > { %p1536_p1 = scmp.eq.s32.totalorder %s1200_s18, 0  ;;  %p1201_p2 = scmp.ge.s32.totalorder %s1472_s17, 1 }
   0x8   : > { %p131_p3 = scmp.lt.s32.totalorder %s1472_s17, 3  ;;  %s142_s23 = sshll.u32 %s1806_s1, 4  ;;  %s143_s23 = int_to_ptr.hbm [resolvable:$true] %s142_s23 }
   0x9   : > { %p1544_p4 = por %p1536_p1, %p52_p0  ;;  %s1474_s25 = smov [#allocation7]  }
   0xa   : > { %p1551_p5 = pnand %p1201_p2, %p131_p3  ;;  %s144_s26 = sshll.u32 %s1474_s25, 4  ;;  %s145_s26 = int_to_ptr.vmem [resolvable:$true] %s144_s26 }
   0xb   : > { %s1475_s27 = smov 128   ;;  %s1476_s28 = smov 8  }
   0xc   : > { %p1230_p6 = pneg %p1551_p5  ;;  %s27_s29 = sadd.s32 1, %s1468_s16 }
   0xd   : > { %p28_p8 = scmp.ge.s32.totalorder %s27_s29, 2  ;;  %s39_s30 = sadd.s32 1, %s1460_s14 }
   0xe   : > { %p1231_p7 = pnand %p1230_p6, %p1536_p1  ;;  %p46_p9 = scmp.ne.s32.totalorder %s1460_s14, %s1456_s13 }
   0xf   : > { %p47_p10 = scmp.eq.s32.totalorder %s1472_s17, 0  ;;  %s1819_s29 = smov (%p28_p8, %s27_s29), 0 }
  0x10   : > { %1233 = dma.hbm_to_vmem [thread:$0]  (!%p1231_p7), %s143_s23, 512, %s145_s26, [#allocation8], %s1475_s27, %s1475_s27, %s1476_s28  }
  0x11   : > { %p1566_p11 = por %p47_p10, %p46_p9  ;;  %p1239_p12 = scmp.lt.s32.totalorder %s1472_s17, 2 }
  0x12   : > { %s34_s5 = ssub.s32 %s1468_s16, %s1819_s29  ;;  %s161_s6 = sand.u32 1, %s1460_s14  }
  0x13   : > { %p37_p13 = scmp.eq.s32.totalorder %s34_s5, 0  ;;  %s1204_s7 = sshll.u32 %s161_s6, 3 }
  0x14   : > { %s1219_s8 = sshll.u32 %s1468_s16, 3  ;;  %s165_s22 = scalar_lea.vmem [#allocation4], %s1204_s7 }
  0x15   : > { %s1576_s9 = scalar_select %p37_p13, %s1460_s14, %s39_s30  }
  0x16   : > { %s171_s12 = scalar_lea.hbm %s1805_s0, %s1219_s8  ;;  %s174_s23 = sshll.u32 %s165_s22, 4  ;;  %s175_s23 = int_to_ptr.vmem [resolvable:$true] %s174_s23 }
  0x17   : > { %s172_s21 = sshll.u32 %s171_s12, 4  ;;  %p1235_p0 = pnand %p1239_p12, %p1566_p11  ;;  %s173_s21 = int_to_ptr.hbm [resolvable:$true] %s172_s21 }
  0x18   : > { %s162_s25 = scalar_lea.sflag [#allocation5], %s161_s6  ;;  %s1477_s26 = smov 32  }
  0x19   : > { %s1478_s27 = smov 2   ;;  %186 = sbr.rel (%p1551_p5) target bundleno = 2473 (0x9a9), region = 32 }
  0x1a   : > { %1237 = dma.hbm_to_vmem [thread:$0]  (!%p1235_p0), %s173_s21, 128, %s175_s23, %s162_s25, %s1477_s26, %s1477_s26, %s1478_s27  }
  0x1b   : > { %s188_s28 = sand.u32 (!%p1551_p5), 1, %s1456_s13  }
  0x1c   : > { %s1208_s30 = sshll.u32 (!%p1551_p5), %s188_s28, 3  ;;  %s189_s5 = scalar_lea.sflag (!%p1551_p5), [#allocation5], %s188_s28 }
  0x1d   : > { %s1588_s8 = scalar_lea.vmem (!%p1551_p5), [#allocation4], %s1208_s30 }
  0x1e   : > { %1439 = dma.done.wait (%p1544_p4), %s189_s5, 128  }
  0x1f   : > { %1441 = vsyncadd (%p1544_p4), %s189_s5, 4294967168 }
  0x20   : > { %1443 = dma.done.wait (%p1536_p1), [#allocation8], 512  }
  0x21   : > { %1445 = vsyncadd (%p1536_p1), [#allocation8], 4294966784  ;;  %p1210_p2 = scmp.ne.s32.totalorder %s1464_s15, 0 }
  0x23   : > { %220 = sbr.rel (%p1210_p2) target bundleno = 43 (0x2b), region = 44 }
  0x28   : > { %vm221_vm0 = vcmask 254976   ;;  %v1479_v0 = vmov 0.0  }
  0x29   : > { %222 = vst.msk [vmem:[#allocation2] sm:$0x3] %vm221_vm0, %v1479_v0 }
  0x2a   : > { %223 = vst.msk [vmem:[#allocation3] sm:$0x3] %vm221_vm0, %v1479_v0 }
  0x2b PF: > { %v227_v1 = vld [vmem:[#allocation7 + $0x18] sm:$0xff]  ;;  %v226_v2 = vld [vmem:[#allocation7 + $0x10] sm:$0xff]  ;;  %v225_v3 = vld [vmem:[#allocation7 + $0x8] sm:$0xff]  ;;  %vm236_vm1 = vcmask 261120   ;;  %s1480_s24 = smov 32   ;;  %s1481_s4 = smov 64  }
  0x2c   : > { %v1599_v4 = vand.u32 4294901760, %v227_v1  ;;  %v1601_v5 = vand.u32 4294901760, %v226_v2  ;;  %v1603_v6 = vand.u32 4294901760, %v225_v3  ;;  %v224_v7 = vld [vmem:[#allocation7] sm:$0xff]  ;;  %v1707_v38 = vld [vmem:[%s1807_s2] ss:$0 sm:$0xff] }
  0x2d   : > { %v1605_v9 = vand.u32 4294901760, %v224_v7  ;;  %v234_v40 = vld [vmem:[%s1588_s8] sm:$0x3]  ;;  %s1482_s6 = smov 96   ;;  %vm1104_vm2 = vcmask 254976   ;;  %p1214_p1 = scmp.ne.s32.totalorder %s1464_s15, 1 }
  0x2e   : > { %v1609_v11 = vsub.f32 %v227_v1, %v1599_v4  ;;  %253 = vmatpush.msra.mxu0 %v1599_v4  ;;  %v1613_v12 = vsub.f32 %v226_v2, %v1601_v5  ;;  %353 = vmatpush.msra.mxu3 %v1599_v4  ;;  %v1617_v13 = vsub.f32 %v225_v3, %v1603_v6 }
  0x2f   : > { %v1620_v15 = vsub.f32 %v224_v7, %v1605_v9  ;;  %v235_v43 = vadd.f32 %v1707_v38, %v234_v40 }
  0x30   : > { %v232_v8 = vld [vmem:[#allocation2] sm:$0x3]  ;;  %324 = vmatpush.msra.mxu2 %v1609_v11  ;;  %255 = vmatpush.msra.mxu0 %v1601_v5  ;;  %v1625_v16 = vand.u32 4294901760, %v1609_v11  ;;  %v1628_v17 = vand.u32 4294901760, %v1613_v12  ;;  %v1631_v19 = vand.u32 4294901760, %v1617_v13 }
  0x31   : > { %v238_v10 = vsel %vm236_vm1, %v232_v8, 0  ;;  %355 = vmatpush.msra.mxu3 %v1601_v5  ;;  %v1635_v20 = vand.u32 4294901760, %v1620_v15  ;;  %v233_v48 = vld [vmem:[#allocation3] sm:$0x3] }
  0x32   : > { %v260_v14 = vand.u32 4294901760, %v238_v10  ;;  %327 = vmatpush.msra.mxu2 %v1613_v12  ;;  %v284_v21 = vsub.f32 %v1609_v11, %v1625_v16  ;;  %257 = vmatpush.msra.mxu0 %v1603_v6  ;;  %v290_v22 = vsub.f32 %v1613_v12, %v1628_v17  ;;  %v296_v23 = vsub.f32 %v1617_v13, %v1631_v19 }
  0x33   : > { %357 = vmatpush.msra.mxu3 %v1603_v6  ;;  %v302_v28 = vsub.f32 %v1620_v15, %v1635_v20 }
  0x34   : > { %v261_v18 = vsub.f32 %v238_v10, %v260_v14  ;;  %v1646_v25 = vand.u32 4294901760, %v284_v21  ;;  %330 = vmatpush.msra.mxu2 %v1617_v13  ;;  %v1649_v26 = vand.u32 4294901760, %v290_v22  ;;  %259 = vmatpush.msra.mxu0 %v1605_v9  ;;  %v1658_v29 = vand.u32 4294901760, %v296_v23  ;;  %v1211_v23 = vld [vmem:[%s1588_s8 + $0x2] sm:$0x3] }
  0x35   : > { %359 = vmatpush.msra.mxu3 %v1605_v9  ;;  %v1661_v31 = vand.u32 4294901760, %v302_v28 }
  0x36   : > { %v262_v24 = vand.u32 4294901760, %v261_v18  ;;  %382 = vmatpush.msrb.mxu0 %v1625_v16  ;;  %286 = vmatpush.msra.mxu1 %v1646_v25 }
  0x37   : > { %333 = vmatpush.msra.mxu2 %v1620_v15  ;;  %506 = vmatpush.msrb.mxu3 %v1646_v25 }
  0x38   : > { %v263_v27 = vsub.f32 %v261_v18, %v262_v24  ;;  %336 = vmatmul.f32.vlgmr.msra.gmra.mxu2 %v261_v18  ;;  %363 = vmatmul.f32.vlgmr.msra.gmra.mxu3 %v262_v24 }
  0x39   : > { %292 = vmatpush.msra.mxu1 %v1649_v26  ;;  %386 = vmatpush.msrb.mxu0 %v1628_v17 }
  0x3a   : > { %v264_v30 = vand.u32 4294901760, %v263_v27  ;;  %473 = vmatpush.msrb.mxu2 %v1599_v4  ;;  %512 = vmatpush.msrb.mxu3 %v1649_v26 }
  0x3b   : > { %298 = vmatpush.msra.mxu1 %v1658_v29  ;;  %390 = vmatpush.msrb.mxu0 %v1631_v19 }
  0x3c   : > { %265 = vmatmul.f32.vlgmr.msra.gmra.mxu0 %v264_v30  ;;  %475 = vmatpush.msrb.mxu2 %v1601_v5 }
  0x3d   : > { %304 = vmatpush.msra.mxu1 %v1661_v31  ;;  %394 = vmatpush.msrb.mxu0 %v1635_v20 }
  0x3e   : > { %306 = vmatmul.f32.vlgmr.msra.gmra.mxu1 %v260_v14  ;;  %518 = vmatpush.msrb.mxu3 %v1658_v29 }
  0x3f   : > { %413 = vmatpush.msrb.mxu1 %v1599_v4  ;;  %544 = vmatpush.msra.mxu0 %v1609_v11 }
  0x40   : > { %477 = vmatpush.msrb.mxu2 %v1603_v6  ;;  %524 = vmatpush.msrb.mxu3 %v1661_v31 }
  0x41   : > { %415 = vmatpush.msrb.mxu1 %v1601_v5  ;;  %547 = vmatpush.msra.mxu0 %v1613_v12 }
  0x42   : > { %633 = vmatpush.msra.mxu3 %v1599_v4  ;;  %479 = vmatpush.msrb.mxu2 %v1605_v9 }
  0x43   : > { %417 = vmatpush.msrb.mxu1 %v1603_v6  ;;  %550 = vmatpush.msra.mxu0 %v1617_v13 }
  0x44   : > { %396 = vmatmul.f32.vlgmr.msrb.gmra.mxu0 %v260_v14  ;;  %635 = vmatpush.msra.mxu3 %v1601_v5 }
  0x45   : > { %419 = vmatpush.msrb.mxu1 %v1605_v9  ;;  %553 = vmatpush.msra.mxu0 %v1620_v15 }
  0x46   : > { %421 = vmatmul.f32.vlgmr.msrb.gmra.mxu1 %v260_v14  ;;  %637 = vmatpush.msra.mxu3 %v1603_v6 }
  0x47   : > { %573 = vmatpush.msra.mxu1 %v1599_v4  ;;  %602 = vmatpush.msra.mxu2 %v1625_v16 }
  0x48   : > { %689 = vmatpush.msrb.mxu0 %v1599_v4  ;;  %639 = vmatpush.msra.mxu3 %v1605_v9 }
  0x49   : > { %575 = vmatpush.msra.mxu1 %v1601_v5  ;;  %606 = vmatpush.msra.mxu2 %v1628_v17 }
  0x4a   : > { %691 = vmatpush.msrb.mxu0 %v1601_v5 }
  0x4b   : > { %577 = vmatpush.msra.mxu1 %v1603_v6  ;;  %610 = vmatpush.msra.mxu2 %v1631_v19 }
  0x4c   : > { %693 = vmatpush.msrb.mxu0 %v1603_v6 }
  0x4d   : > { %579 = vmatpush.msra.mxu1 %v1605_v9  ;;  %614 = vmatpush.msra.mxu2 %v1635_v20 }
  0x4e   : > { %695 = vmatpush.msrb.mxu0 %v1605_v9 }
  0x4f   : > { %722 = vmatpush.msrb.mxu1 %v1646_v25 }
  0x51   : > { %728 = vmatpush.msrb.mxu1 %v1649_v26 }
  0x53   : > { %734 = vmatpush.msrb.mxu1 %v1658_v29 }
  0x55   : > { %740 = vmatpush.msrb.mxu1 %v1661_v31 }
  0xb9   : > { %v266_v32 = vpop.f32.mrf.mxu0 }
  0xbb   : > { %v307_v33 = vpop.f32.mrf.mxu1  ;;  %v337_v34 = vpop.f32.mrf.mxu2 }
  0xbc   : > { %v308_v35 = vadd.f32 %v307_v33, %v266_v32  ;;  %v364_v36 = vpop.f32.mrf.mxu3 }
  0xbe   : > { %v338_v37 = vadd.f32 %v337_v34, %v308_v35 }
  0xc0   : > { %v365_v41 = vadd.f32 %v364_v36, %v338_v37 }
  0xc1   : > { %v397_v39 = vpop.f32.mrf.mxu0 }
  0xc2   : > { %v398_v42 = vadd.f32 %v397_v39, %v365_v41 }
  0xc3   : > { %v422_v44 = vpop.f32.mrf.mxu1 }
  0xc4   : > { %v423_v45 = vadd.f32 %v422_v44, %v398_v42 }
  0xc6   : > { %v425_v46 = vadd.f32 %v423_v45, %v235_v43 }
  0xc8   : > { %1302 = vtanh.f32 %v425_v46  ;;  %v426_v49 = vmul.f32 0.5, %v425_v46 }
  0xca   : > { %1304 = vtanh.f32 %v426_v49 }
  0xce   : > { %v1303_v47 = vpop.eup %1302 }
  0xcf   : > { %437 = vrot.lane.b32.xlu0 %v1303_v47, %s1480_s24 }
  0xd0   : > { %v1305_v50 = vpop.eup %1304 }
  0xd1   : > { %v428_v51 = vmul.f32 0.5, %v1305_v50 }
  0xd3   : > { %v429_v52 = vadd.f32 0.5, %v428_v51 }
  0xd7   : > { %432 = vrot.lane.b32.xlu0 %v233_v48, %s1480_s24 }
 0x141   : > { %v438_v53 = vpop.permute.xlu0 %437 }
 0x142   : > { %v440_v54 = vmul.f32 %v438_v53, %v429_v52 }
 0x144   : > { %442 = vrot.lane.b32.xlu1 %v440_v54, %s1480_s24 }
 0x149   : > { %v433_v55 = vpop.permute.xlu0 %432 }
 0x14a   : > { %v435_v56 = vmul.f32 %v433_v55, %v429_v52 }
 0x1b6   : > { %v443_v57 = vpop.permute.xlu1 %442 }
 0x1b7   : > { %v1714_v58 = vadd.f32 %v443_v57, %v435_v56 }
 0x1b9   : > { %1306 = vtanh.f32 %v1714_v58 }
 0x1bf   : > { %v1307_v59 = vpop.eup %1306 }
 0x1c0   : > { %448 = vrot.lane.b32.xlu1 %v1307_v59, %s1480_s24 }
 0x232   : > { %v449_v60 = vpop.permute.xlu1 %448 }
 0x233   : > { %v451_v61 = vmul.f32 %v449_v60, %v429_v52 }
 0x235   : > { %456 = vrot.lane.b32.xlu2 %v451_v61, %s1481_s4 }
 0x28f   : > { %v457_v62 = vpop.permute.xlu2 %456 }
 0x290   : > { %v458_v63 = vsel %vm236_vm1, %v457_v62, 0 }
 0x291   : > { %v480_v0 = vand.u32 4294901760, %v458_v63 }
 0x293   : > { %v481_v1 = vsub.f32 %v458_v63, %v480_v0  ;;  %526 = vmatmul.f32.vlgmr.msrb.gmra.mxu3 %v480_v0 }
 0x294   : > { %789 = vmatpush.msrb.mxu3 %v1599_v4 }
 0x295   : > { %v482_v2 = vand.u32 4294901760, %v481_v1  ;;  %556 = vmatmul.f32.vlgmr.msra.gmra.mxu0 %v481_v1 }
 0x296   : > { %791 = vmatpush.msrb.mxu3 %v1601_v5  ;;  %818 = vmatpush.msra.mxu0 %v1625_v16 }
 0x297   : > { %583 = vmatmul.f32.vlgmr.msra.gmra.mxu1 %v482_v2  ;;  %v483_v3 = vsub.f32 %v481_v1, %v482_v2 }
 0x298   : > { %793 = vmatpush.msrb.mxu3 %v1603_v6  ;;  %849 = vmatpush.msra.mxu1 %v1599_v4 }
 0x299   : > { %v484_v7 = vand.u32 4294901760, %v483_v3  ;;  %822 = vmatpush.msra.mxu0 %v1628_v17 }
 0x29a   : > { %795 = vmatpush.msrb.mxu3 %v1605_v9  ;;  %851 = vmatpush.msra.mxu1 %v1601_v5 }
 0x29b   : > { %485 = vmatmul.f32.vlgmr.msrb.gmra.mxu2 %v484_v7  ;;  %641 = vmatmul.f32.vlgmr.msra.gmra.mxu3 %v480_v0 }
 0x29c   : > { %760 = vmatpush.msrb.mxu2 %v1609_v11  ;;  %853 = vmatpush.msra.mxu1 %v1603_v6 }
 0x29d   : > { %826 = vmatpush.msra.mxu0 %v1631_v19  ;;  %938 = vmatpush.msra.mxu3 %v1646_v25 }
 0x29e   : > { %763 = vmatpush.msrb.mxu2 %v1613_v12  ;;  %855 = vmatpush.msra.mxu1 %v1605_v9 }
 0x29f   : > { %830 = vmatpush.msra.mxu0 %v1635_v20  ;;  %944 = vmatpush.msra.mxu3 %v1649_v26  ;;  %v454_v26 = vadd.f32 %v1707_v38, %v1211_v23 }
 0x2a0   : > { %766 = vmatpush.msrb.mxu2 %v1617_v13 }
 0x2a1   : > { %950 = vmatpush.msra.mxu3 %v1658_v29 }
 0x2a2   : > { %769 = vmatpush.msrb.mxu2 %v1620_v15 }
 0x2a3   : > { %616 = vmatmul.f32.vlgmr.msra.gmra.mxu2 %v480_v0  ;;  %956 = vmatpush.msra.mxu3 %v1661_v31 }
 0x2a4   : > { %905 = vmatpush.msra.mxu2 %v1599_v4 }
 0x2a6   : > { %907 = vmatpush.msra.mxu2 %v1601_v5 }
 0x2a8   : > { %909 = vmatpush.msra.mxu2 %v1603_v6 }
 0x2aa   : > { %911 = vmatpush.msra.mxu2 %v1605_v9 }
 0x312   : > { %v557_v18 = vpop.f32.mrf.mxu0 }
 0x314   : > { %v584_v22 = vpop.f32.mrf.mxu1 }
 0x316   : > { %v527_v8 = vpop.f32.mrf.mxu3 }
 0x31e   : > { %v486_v10 = vpop.f32.mrf.mxu2  ;;  %v642_v28 = vpop.f32.mrf.mxu3 }
 0x31f   : > { %v528_v14 = vadd.f32 %v527_v8, %v486_v10 }
 0x321   : > { %v558_v21 = vadd.f32 %v557_v18, %v528_v14 }
 0x323   : > { %v585_v24 = vadd.f32 %v584_v22, %v558_v21 }
 0x326   : > { %v617_v25 = vpop.f32.mrf.mxu2 }
 0x327   : > { %v618_v27 = vadd.f32 %v617_v25, %v585_v24 }
 0x329   : > { %v643_v29 = vadd.f32 %v642_v28, %v618_v27  ;;  %v1213_v28 = vld [vmem:[%s1588_s8 + $0x6] sm:$0x3] }
 0x32b   : > { %v645_v30 = vadd.f32 %v643_v29, %v454_v26 }
 0x32d   : > { %1308 = vtanh.f32 %v645_v30  ;;  %v646_v32 = vmul.f32 0.5, %v645_v30 }
 0x32f   : > { %1310 = vtanh.f32 %v646_v32 }
 0x333   : > { %v1309_v31 = vpop.eup %1308 }
 0x334   : > { %653 = vrot.lane.b32.xlu2 %v1309_v31, %s1480_s24  ;;  %v886_v31 = vadd.f32 %v1707_v38, %v1213_v28 }
 0x335   : > { %v1311_v33 = vpop.eup %1310 }
 0x336   : > { %v648_v34 = vmul.f32 0.5, %v1311_v33 }
 0x338   : > { %v649_v35 = vadd.f32 0.5, %v648_v34 }
 0x33a   : > { %v651_v39 = vmul.f32 %v649_v35, %v1714_v58 }
 0x38e   : > { %v654_v36 = vpop.permute.xlu2 %653 }
 0x38f   : > { %v656_v37 = vmul.f32 %v654_v36, %v649_v35 }
 0x391   : > { %658 = vrot.lane.b32.xlu0 %v656_v37, %s1480_s24 }
 0x403   : > { %v659_v40 = vpop.permute.xlu0 %658 }
 0x404   : > { %v661_v41 = vadd.f32 %v659_v40, %v651_v39 }
 0x406   : > { %1312 = vtanh.f32 %v661_v41 }
 0x40c   : > { %v1313_v42 = vpop.eup %1312 }
 0x40d   : > { %664 = vrot.lane.b32.xlu1 %v1313_v42, %s1480_s24 }
 0x47f   : > { %v665_v43 = vpop.permute.xlu1 %664 }
 0x480   : > { %v667_v44 = vmul.f32 %v665_v43, %v649_v35 }
 0x482   : > { %672 = vrot.lane.b32.xlu2 %v667_v44, %s1481_s4 }
 0x4dc   : > { %v673_v45 = vpop.permute.xlu2 %672 }
 0x4dd   : > { %v674_v46 = vsel %vm236_vm1, %v673_v45, 0 }
 0x4de   : > { %v696_v47 = vand.u32 4294901760, %v674_v46 }
 0x4e0   : > { %v697_v48 = vsub.f32 %v674_v46, %v696_v47  ;;  %742 = vmatmul.f32.vlgmr.msrb.gmra.mxu1 %v696_v47 }
 0x4e1   : > { %1005 = vmatpush.msrb.mxu1 %v1599_v4 }
 0x4e2   : > { %v698_v49 = vand.u32 4294901760, %v697_v48  ;;  %772 = vmatmul.f32.vlgmr.msrb.gmra.mxu2 %v697_v48 }
 0x4e3   : > { %1007 = vmatpush.msrb.mxu1 %v1601_v5  ;;  %1034 = vmatpush.msrb.mxu2 %v1625_v16 }
 0x4e4   : > { %v699_v50 = vsub.f32 %v697_v48, %v698_v49  ;;  %799 = vmatmul.f32.vlgmr.msrb.gmra.mxu3 %v698_v49 }
 0x4e5   : > { %1009 = vmatpush.msrb.mxu1 %v1603_v6  ;;  %1065 = vmatpush.msrb.mxu3 %v1599_v4 }
 0x4e6   : > { %v700_v51 = vand.u32 4294901760, %v699_v50  ;;  %1038 = vmatpush.msrb.mxu2 %v1628_v17 }
 0x4e7   : > { %1011 = vmatpush.msrb.mxu1 %v1605_v9  ;;  %1067 = vmatpush.msrb.mxu3 %v1601_v5 }
 0x4e8   : > { %701 = vmatmul.f32.vlgmr.msrb.gmra.mxu0 %v700_v51  ;;  %857 = vmatmul.f32.vlgmr.msra.gmra.mxu1 %v696_v47 }
 0x4e9   : > { %976 = vmatpush.msrb.mxu0 %v1609_v11  ;;  %1069 = vmatpush.msrb.mxu3 %v1603_v6  ;;  %v1212_v6 = vld [vmem:[%s1588_s8 + $0x4] sm:$0x3] }
 0x4ea   : > { %1042 = vmatpush.msrb.mxu2 %v1631_v19 }
 0x4eb   : > { %979 = vmatpush.msrb.mxu0 %v1613_v12  ;;  %1071 = vmatpush.msrb.mxu3 %v1605_v9  ;;  %v670_v12 = vadd.f32 %v1707_v38, %v1212_v6 }
 0x4ec   : > { %1046 = vmatpush.msrb.mxu2 %v1635_v20 }
 0x4ed   : > { %982 = vmatpush.msrb.mxu0 %v1617_v13 }
 0x4ef   : > { %985 = vmatpush.msrb.mxu0 %v1620_v15 }
 0x4f0   : > { %832 = vmatmul.f32.vlgmr.msra.gmra.mxu0 %v696_v47 }
 0x55d   : > { %v743_v4 = vpop.f32.mrf.mxu1 }
 0x565   : > { %v702_v5 = vpop.f32.mrf.mxu0  ;;  %v773_v17 = vpop.f32.mrf.mxu2 }
 0x566   : > { %v744_v16 = vadd.f32 %v743_v4, %v702_v5  ;;  %v858_v9 = vpop.f32.mrf.mxu1 }
 0x567   : > { %v800_v52 = vpop.f32.mrf.mxu3 }
 0x568   : > { %v774_v11 = vadd.f32 %v773_v17, %v744_v16 }
 0x56a   : > { %v801_v53 = vadd.f32 %v800_v52, %v774_v11 }
 0x56d   : > { %v833_v19 = vpop.f32.mrf.mxu0 }
 0x56e   : > { %v834_v54 = vadd.f32 %v833_v19, %v801_v53 }
 0x570   : > { %v859_v55 = vadd.f32 %v858_v9, %v834_v54 }
 0x572   : > { %v861_v20 = vadd.f32 %v859_v55, %v670_v12 }
 0x574   : > { %1314 = vtanh.f32 %v861_v20  ;;  %v862_v15 = vmul.f32 0.5, %v861_v20 }
 0x576   : > { %1316 = vtanh.f32 %v862_v15 }
 0x57a   : > { %v1315_v13 = vpop.eup %1314 }
 0x57b   : > { %869 = vrot.lane.b32.xlu0 %v1315_v13, %s1480_s24 }
 0x57c   : > { %v1317_v56 = vpop.eup %1316 }
 0x57d   : > { %v864_v57 = vmul.f32 0.5, %v1317_v56 }
 0x57f   : > { %v865_v58 = vadd.f32 0.5, %v864_v57 }
 0x581   : > { %v867_v61 = vmul.f32 %v865_v58, %v661_v41 }
 0x5ed   : > { %v870_v59 = vpop.permute.xlu0 %869 }
 0x5ee   : > { %v872_v60 = vmul.f32 %v870_v59, %v865_v58 }
 0x5f0   : > { %874 = vrot.lane.b32.xlu1 %v872_v60, %s1480_s24 }
 0x662   : > { %v875_v62 = vpop.permute.xlu1 %874 }
 0x663   : > { %v877_v63 = vadd.f32 %v875_v62, %v867_v61 }
 0x665   : > { %1318 = vtanh.f32 %v877_v63 }
 0x66b   : > { %v1319_v0 = vpop.eup %1318 }
 0x66c   : > { %880 = vrot.lane.b32.xlu2 %v1319_v0, %s1480_s24 }
 0x6c6   : > { %v881_v1 = vpop.permute.xlu2 %880 }
 0x6c7   : > { %v883_v2 = vmul.f32 %v881_v1, %v865_v58 }
 0x6c9   : > { %888 = vrot.lane.b32.xlu0 %v883_v2, %s1481_s4 }
 0x73b   : > { %v889_v3 = vpop.permute.xlu0 %888 }
 0x73c   : > { %v890_v7 = vsel %vm236_vm1, %v889_v3, 0 }
 0x73d   : > { %v912_v8 = vand.u32 4294901760, %v890_v7 }
 0x73f   : > { %v913_v10 = vsub.f32 %v890_v7, %v912_v8  ;;  %958 = vmatmul.f32.vlgmr.msra.gmra.mxu3 %v912_v8 }
 0x741   : > { %v914_v14 = vand.u32 4294901760, %v913_v10  ;;  %988 = vmatmul.f32.vlgmr.msrb.gmra.mxu0 %v913_v10 }
 0x743   : > { %v915_v18 = vsub.f32 %v913_v10, %v914_v14  ;;  %1015 = vmatmul.f32.vlgmr.msrb.gmra.mxu1 %v914_v14 }
 0x745   : > { %v916_v21 = vand.u32 4294901760, %v915_v18 }
 0x747   : > { %917 = vmatmul.f32.vlgmr.msra.gmra.mxu2 %v916_v21  ;;  %1073 = vmatmul.f32.vlgmr.msrb.gmra.mxu3 %v912_v8 }
 0x74f   : > { %1048 = vmatmul.f32.vlgmr.msrb.gmra.mxu2 %v912_v8 }
 0x7be   : > { %v989_v25 = vpop.f32.mrf.mxu0 }
 0x7c0   : > { %v1016_v27 = vpop.f32.mrf.mxu1 }
 0x7c2   : > { %v959_v22 = vpop.f32.mrf.mxu3 }
 0x7ca   : > { %v918_v23 = vpop.f32.mrf.mxu2  ;;  %v1074_v33 = vpop.f32.mrf.mxu3 }
 0x7cb   : > { %v960_v24 = vadd.f32 %v959_v22, %v918_v23 }
 0x7cd   : > { %v990_v26 = vadd.f32 %v989_v25, %v960_v24 }
 0x7cf   : > { %v1017_v29 = vadd.f32 %v1016_v27, %v990_v26 }
 0x7d2   : > { %v1049_v30 = vpop.f32.mrf.mxu2 }
 0x7d3   : > { %v1050_v32 = vadd.f32 %v1049_v30, %v1017_v29 }
 0x7d5   : > { %v1075_v34 = vadd.f32 %v1074_v33, %v1050_v32 }
 0x7d7   : > { %v1077_v35 = vadd.f32 %v1075_v34, %v886_v31 }
 0x7d9   : > { %1320 = vtanh.f32 %v1077_v35  ;;  %v1078_v37 = vmul.f32 0.5, %v1077_v35 }
 0x7db   : > { %1322 = vtanh.f32 %v1078_v37 }
 0x7df   : > { %v1321_v36 = vpop.eup %1320 }
 0x7e0   : > { %1085 = vrot.lane.b32.xlu1 %v1321_v36, %s1480_s24 }
 0x7e1   : > { %v1323_v39 = vpop.eup %1322 }
 0x7e2   : > { %v1080_v40 = vmul.f32 0.5, %v1323_v39 }
 0x7e4   : > { %v1081_v41 = vadd.f32 0.5, %v1080_v40 }
 0x7e6   : > { %v1083_v44 = vmul.f32 %v1081_v41, %v877_v63 }
 0x852   : > { %v1086_v42 = vpop.permute.xlu1 %1085 }
 0x853   : > { %v1088_v43 = vmul.f32 %v1086_v42, %v1081_v41 }
 0x855   : > { %1090 = vrot.lane.b32.xlu2 %v1088_v43, %s1480_s24 }
 0x8af   : > { %v1091_v45 = vpop.permute.xlu2 %1090 }
 0x8b0   : > { %v1093_v38 = vadd.f32 %v1091_v45, %v1083_v44 }
 0x8b2   : > { %1324 = vtanh.f32 %v1093_v38  ;;  %1107 = vrot.lane.b32.xlu2 %v1093_v38, %s1482_s6 }
 0x8b8   : > { %v1325_v46 = vpop.eup %1324 }
 0x8b9   : > { %1096 = vrot.lane.b32.xlu0 %v1325_v46, %s1480_s24 }
 0x90c   : > { %v1108_v47 = vpop.permute.xlu2 %1107 }
 0x90d   : > { %1110 = vst.msk [vmem:[#allocation3] sm:$0x3] %vm1104_vm2, %v1108_v47 }
 0x92b   : > { %v1097_v48 = vpop.permute.xlu0 %1096 }
 0x92c   : > { %v1099_v49 = vmul.f32 %v1097_v48, %v1081_v41 }
 0x92e   : > { %1101 = vrot.lane.b32.xlu1 %v1099_v49, %s1481_s4 }
 0x99d   : > { %1114 = sbr.rel (%p1214_p1) target bundleno = 2467 (0x9a3), region = 48 }
 0x9a0   : > { %v1102_v50 = vpop.permute.xlu1 %1101 }
 0x9a1   : > { %1105 = vst.msk [vmem:[#allocation2] sm:$0x3] %vm1104_vm2, %v1102_v50 }
 0x9a2   : > { %1115 = vst.msk [vmem:[#allocation9] sm:$0x3] %vm1104_vm2, %v1102_v50 }
 0x9a3 PF: > { %p1241_p3 = scmp.eq.s32.totalorder %s1200_s18, 1  ;;  %s1126_s11 = sshll.u32 %s1808_s3, 4  ;;  %s1127_s11 = int_to_ptr.hbm [resolvable:$true] %s1126_s11 }
 0x9a4   : > { %s1483_s12 = smov [#allocation9]  }
 0x9a5   : > { %s1124_s21 = sshll.u32 %s1483_s12, 4  ;;  %s1125_s21 = int_to_ptr.vmem [resolvable:$true] %s1124_s21 }
 0x9a6   : > { %1227 = dma.vmem_to_hbm [thread:$0]  (%p1241_p3), %s1125_s21, 32, %s1127_s11, [#allocation6]  }
 0x9a7   : > { %1447 = dma.done.wait (%p1241_p3), [#allocation6], 32  }
 0x9a8   : > { %1449 = vsyncadd (%p1241_p3), [#allocation6], 4294967264 }
 0x9a9 PF: > { %s18_s17 = sadd.s32 1, %s1472_s17   ;;  %s1813_s12 = smov %s1456_s13 }
 0x9aa   : > { %p15_p4 = scmp.ge.s32.totalorder %s18_s17, 4   ;;  %s1814_s13 = smov %s1460_s14 }
 0x9ab   : > { %s1815_s14 = smov %s1576_s9  ;;  %s1816_s15 = smov %s1468_s16 }
 0x9ac   : > { %s1817_s16 = smov %s1819_s29  ;;  %17 = sbr.rel (!%p15_p4) target bundleno = 6 (0x6), region = 85 }
 0x9b1   :  { %1140 = vsyncpa [#allocation5], 1 }
 0x9b2   :  { %1142 = vsyncpa [#allocation5 + $0x1], 1 }
 0x9b3   :  { %1143 = vsyncpa [#allocation8], 1 }
 0x9b4   :  { %1144 = vsyncpa [#allocation6], 1 }
 0x9b5   :  { %1146 = vsyncpa [#allocation6 + $0x1], 1 }

</bundles_post_ra>
